<compile_context>
chip_gen: v5e
topology: v5e:2x2
jax: 0.10.0
libtpu: 0.0.40
codegen_flags: <defaults>
</compile_context>

<pallas_src>
import functools

import jax
import jax.numpy as jnp
from jax.experimental import pallas as pl
from jax.experimental.pallas import tpu as pltpu

_LANES = 128
_SUBLANES = 8
_MAX_BLOCK_ROWS = 2048   # (2048,128) f32 = 1 MiB/block; 2 in x 2 bufs = 4 MiB
_NUM_CORES = 2           # leading "parallel" axis; uses both TCs on v7x
_THRESH = 0.05


def _mse_eff_kernel(src_ref, tar_ref, sum_ref, cnt_ref, *,
                    block_rows, blocks_per_core, total_rows):
    c = pl.program_id(0)   # core slice
    j = pl.program_id(1)   # block within this core's slice

    @pl.when(j == 0)
    def _():
        sum_ref[...] = jnp.zeros_like(sum_ref)
        cnt_ref[...] = jnp.zeros_like(cnt_ref)

    # Logical (unclamped) block id.  Rows past the real array (ragged last
    # block, or clamped duplicate blocks for the second core) are masked out.
    logical_block = c * blocks_per_core + j
    row_ids = logical_block * block_rows + jax.lax.broadcasted_iota(
        jnp.int32, (block_rows, 1), 0)
    in_bounds = row_ids < total_rows

    s = src_ref[...].astype(jnp.float32)
    t = tar_ref[...].astype(jnp.float32)

    m = jnp.logical_and(t > _THRESH, in_bounds)
    d = jnp.where(m, s - t, 0.0)
    sq = d * d

    # Collapse (block_rows, 128) -> (8, 128): pure vreg-wise VPU adds
    # (each (8,128) slice is exactly one f32 vreg), then elementwise
    # accumulate into the persistent per-core partial slabs.
    sum_ref[...] += sq.reshape(-1, _SUBLANES, _LANES).sum(axis=0)
    cnt_ref[...] += m.astype(jnp.int32).reshape(-1, _SUBLANES, _LANES).sum(axis=0)


def mse_eff(src: jax.Array, tar: jax.Array) -> jax.Array:
    """Masked MSE: mean of (src - tar)^2 over elements where tar > 0.05."""
    assert src.shape == tar.shape, "src/tar must have the same shape"

    src_f = src.reshape(-1)
    tar_f = tar.reshape(-1)
    n = src_f.shape[0]

    tile_elems = _SUBLANES * _LANES  # 1024
    n_pad = ((n + tile_elems - 1) // tile_elems) * tile_elems
    pad = n_pad - n
    if pad > 0:
        # TODO(synk): this (rare, <=1023-element logical) pad is still a full
        # HBM copy; could be replaced by an element-index tail mask in-kernel.
        # Padding tar with 0 keeps the pad outside the mask (0 <= 0.05).
        src_f = jnp.pad(src_f, (0, pad))
        tar_f = jnp.pad(tar_f, (0, pad))

    rows = n_pad // _LANES                      # multiple of 8
    src2d = src_f.reshape(rows, _LANES)
    tar2d = tar_f.reshape(rows, _LANES)

    block_rows = min(_MAX_BLOCK_ROWS, rows)     # multiple of 8, <= rows
    n_blocks = (rows + block_rows - 1) // block_rows
    blocks_per_core = (n_blocks + _NUM_CORES - 1) // _NUM_CORES

    def in_map(c, j):
        # Clamp deliberately-out-of-range block ids (second core's overhang)
        # to a valid block; the kernel's row mask zeroes their contribution.
        return (jnp.minimum(c * blocks_per_core + j, n_blocks - 1), 0)

    kernel = functools.partial(
        _mse_eff_kernel,
        block_rows=block_rows,
        blocks_per_core=blocks_per_core,
        total_rows=rows,
    )

    bytes_accessed = (src2d.size * src2d.dtype.itemsize
                      + tar2d.size * tar2d.dtype.itemsize)

    sum_out, cnt_out = pl.pallas_call(
        kernel,
        out_shape=(
            jax.ShapeDtypeStruct((_NUM_CORES, _SUBLANES, _LANES), jnp.float32),
            jax.ShapeDtypeStruct((_NUM_CORES, _SUBLANES, _LANES), jnp.int32),
        ),
        grid_spec=pltpu.PrefetchScalarGridSpec(
            num_scalar_prefetch=0,
            grid=(_NUM_CORES, blocks_per_core),
            in_specs=[
                pl.BlockSpec((block_rows, _LANES), in_map),
                pl.BlockSpec((block_rows, _LANES), in_map),
            ],
            out_specs=[
                pl.BlockSpec((None, _SUBLANES, _LANES), lambda c, j: (c, 0, 0)),
                pl.BlockSpec((None, _SUBLANES, _LANES), lambda c, j: (c, 0, 0)),
            ],
        ),
        compiler_params=pltpu.CompilerParams(
            dimension_semantics=("parallel", "arbitrary"),
        ),
        cost_estimate=pl.CostEstimate(
            flops=5 * n, transcendentals=0, bytes_accessed=bytes_accessed),
    )(src2d, tar2d)

    total_sum = jnp.sum(sum_out)                      # f32 partial reduce
    total_cnt = jnp.sum(cnt_out)                      # int32, exact
    # 0/0 -> NaN matches torch's mean over an empty selection.
    return (total_sum / total_cnt.astype(jnp.float32)).astype(jnp.float32)


def _reference(src, tar):
    mask = tar > _THRESH
    diff = jnp.where(mask, src - tar, 0.0)
    ssq = jnp.sum(diff * diff)
    cnt = jnp.sum(mask.astype(jnp.float32))
    return ssq / cnt


if __name__ == "__main__":
    key = jax.random.PRNGKey(0)
    k1, k2 = jax.random.split(key)

    # Small NCHW-like inputs consistent with an image-regression loss.
    shape = (2, 4, 16, 16)
    src = jax.random.uniform(k1, shape, dtype=jnp.float32)
    tar = jax.random.uniform(k2, shape, dtype=jnp.float32)  # ~95% pass mask

    loss = mse_eff(src, tar)
    jax.block_until_ready(loss)

    ref = _reference(src, tar)
    assert jnp.allclose(loss, ref, rtol=1e-5, atol=1e-6), (loss, ref)

    print("KERNEL_OK")
</pallas_src>

<mosaic_0001>
module attributes {stable_mosaic.version = 11 : i64} {
  func.func @_mse_eff_kernel(%arg0: i32, %arg1: i32, %arg2: memref<16x128xf32, #tpu.memory_space<vmem>>, %arg3: memref<16x128xf32, #tpu.memory_space<vmem>>, %arg4: memref<1x8x128xf32, #tpu.memory_space<vmem>>, %arg5: memref<1x8x128xi32, #tpu.memory_space<vmem>>) attributes {dimension_semantics = [#tpu.dimension_semantics<parallel>, #tpu.dimension_semantics<arbitrary>], iteration_bounds = array<i64: 2, 1>, scalar_prefetch = 0 : i64, scratch_operands = 0 : i64, tpu.core_type = #tpu.core_type<tc>, window_params = [{transform_indices = @transform_0, window_bounds = array<i64: 16, 128>}, {transform_indices = @transform_1, window_bounds = array<i64: 16, 128>}, {transform_indices = @transform_2, window_bounds = array<i64: 1, 8, 128>}, {transform_indices = @transform_3, window_bounds = array<i64: 1, 8, 128>}]} {
    %c0_i32 = arith.constant 0 : i32
    %0 = arith.cmpi eq, %arg1, %c0_i32 : i32
    %1 = arith.extui %0 : i1 to i32
    %c0_i32_0 = arith.constant 0 : i32
    %2 = arith.cmpi ne, %1, %c0_i32_0 : i32
    scf.if %2 {
      %cst_20 = arith.constant 0.000000e+00 : f32
      %38 = vector.broadcast %cst_20 : f32 to vector<8x128xf32>
      %c0_21 = arith.constant 0 : index
      %c0_22 = arith.constant 0 : index
      %c0_23 = arith.constant 0 : index
      %39 = vector.load %arg4[%c0_21, %c0_22, %c0_23] : memref<1x8x128xf32, #tpu.memory_space<vmem>>, vector<1x8x128xf32>
      %40 = vector.shape_cast %39 : vector<1x8x128xf32> to vector<8x128xf32>
      %41 = vector.shape_cast %38 : vector<8x128xf32> to vector<1x8x128xf32>
      tpu.vector_store %arg4[%c0_21, %c0_22, %c0_23], %41 {strides = array<i32>} : memref<1x8x128xf32, #tpu.memory_space<vmem>>, vector<1x8x128xf32>,
      %c0_i32_24 = arith.constant 0 : i32
      %42 = vector.broadcast %c0_i32_24 : i32 to vector<8x128xi32>
      %c0_25 = arith.constant 0 : index
      %c0_26 = arith.constant 0 : index
      %c0_27 = arith.constant 0 : index
      %43 = vector.load %arg5[%c0_25, %c0_26, %c0_27] : memref<1x8x128xi32, #tpu.memory_space<vmem>>, vector<1x8x128xi32>
      %44 = vector.shape_cast %43 : vector<1x8x128xi32> to vector<8x128xi32>
      %45 = vector.shape_cast %42 : vector<8x128xi32> to vector<1x8x128xi32>
      tpu.vector_store %arg5[%c0_25, %c0_26, %c0_27], %45 {strides = array<i32>} : memref<1x8x128xi32, #tpu.memory_space<vmem>>, vector<1x8x128xi32>,
    } else {
    }
    %c1_i32 = arith.constant 1 : i32
    %3 = arith.muli %arg0, %c1_i32 : i32
    %4 = arith.addi %3, %arg1 : i32
    %c16_i32 = arith.constant 16 : i32
    %5 = arith.muli %4, %c16_i32 : i32
    %6 = tpu.iota {dimensions = array<i32: 0>} : vector<16x1xi32>
    %7 = vector.broadcast %5 : i32 to vector<16x1xi32>
    %8 = arith.addi %7, %6 : vector<16x1xi32>
    %c16_i32_1 = arith.constant 16 : i32
    %9 = vector.broadcast %c16_i32_1 : i32 to vector<16x1xi32>
    %10 = arith.cmpi slt, %8, %9 : vector<16x1xi32>
    %c0 = arith.constant 0 : index
    %c0_2 = arith.constant 0 : index
    %11 = vector.load %arg2[%c0, %c0_2] : memref<16x128xf32, #tpu.memory_space<vmem>>, vector<16x128xf32>
    %c0_3 = arith.constant 0 : index
    %c0_4 = arith.constant 0 : index
    %12 = vector.load %arg3[%c0_3, %c0_4] : memref<16x128xf32, #tpu.memory_space<vmem>>, vector<16x128xf32>
    %cst = arith.constant 5.000000e-02 : f32
    %13 = vector.broadcast %cst : f32 to vector<16x128xf32>
    %14 = arith.cmpf ogt, %12, %13 : vector<16x128xf32>
    %15 = vector.broadcast %10 : vector<16x1xi1> to vector<16x128xi1>
    %16 = arith.andi %14, %15 : vector<16x128xi1>
    %17 = arith.subf %11, %12 : vector<16x128xf32>
    %cst_5 = arith.constant 0.000000e+00 : f32
    %18 = vector.broadcast %cst_5 : f32 to vector<16x128xf32>
    %19 = arith.select %16, %17, %18 : vector<16x128xi1>, vector<16x128xf32>
    %20 = arith.mulf %19, %19 : vector<16x128xf32>
    %c0_6 = arith.constant 0 : index
    %c0_7 = arith.constant 0 : index
    %c0_8 = arith.constant 0 : index
    %21 = vector.load %arg4[%c0_6, %c0_7, %c0_8] : memref<1x8x128xf32, #tpu.memory_space<vmem>>, vector<1x8x128xf32>
    %22 = vector.shape_cast %21 : vector<1x8x128xf32> to vector<8x128xf32>
    %23 = vector.shape_cast %20 : vector<16x128xf32> to vector<2x8x128xf32>
    %cst_9 = arith.constant dense<0.000000e+00> : vector<8x128xf32>
    %24 = vector.multi_reduction <add>, %23, %cst_9 [0] : vector<2x8x128xf32> to vector<8x128xf32>
    %25 = arith.addf %22, %24 : vector<8x128xf32>
    %c0_10 = arith.constant 0 : index
    %c0_11 = arith.constant 0 : index
    %c0_12 = arith.constant 0 : index
    %26 = vector.load %arg4[%c0_10, %c0_11, %c0_12] : memref<1x8x128xf32, #tpu.memory_space<vmem>>, vector<1x8x128xf32>
    %27 = vector.shape_cast %26 : vector<1x8x128xf32> to vector<8x128xf32>
    %28 = vector.shape_cast %25 : vector<8x128xf32> to vector<1x8x128xf32>
    tpu.vector_store %arg4[%c0_10, %c0_11, %c0_12], %28 {strides = array<i32>} : memref<1x8x128xf32, #tpu.memory_space<vmem>>, vector<1x8x128xf32>,
    %c0_13 = arith.constant 0 : index
    %c0_14 = arith.constant 0 : index
    %c0_15 = arith.constant 0 : index
    %29 = vector.load %arg5[%c0_13, %c0_14, %c0_15] : memref<1x8x128xi32, #tpu.memory_space<vmem>>, vector<1x8x128xi32>
    %30 = vector.shape_cast %29 : vector<1x8x128xi32> to vector<8x128xi32>
    %31 = arith.extui %16 : vector<16x128xi1> to vector<16x128xi32>
    %32 = vector.shape_cast %31 : vector<16x128xi32> to vector<2x8x128xi32>
    %cst_16 = arith.constant dense<0> : vector<8x128xi32>
    %33 = vector.multi_reduction <add>, %32, %cst_16 [0] : vector<2x8x128xi32> to vector<8x128xi32>
    %34 = arith.addi %30, %33 : vector<8x128xi32>
    %c0_17 = arith.constant 0 : index
    %c0_18 = arith.constant 0 : index
    %c0_19 = arith.constant 0 : index
    %35 = vector.load %arg5[%c0_17, %c0_18, %c0_19] : memref<1x8x128xi32, #tpu.memory_space<vmem>>, vector<1x8x128xi32>
    %36 = vector.shape_cast %35 : vector<1x8x128xi32> to vector<8x128xi32>
    %37 = vector.shape_cast %34 : vector<8x128xi32> to vector<1x8x128xi32>
    tpu.vector_store %arg5[%c0_17, %c0_18, %c0_19], %37 {strides = array<i32>} : memref<1x8x128xi32, #tpu.memory_space<vmem>>, vector<1x8x128xi32>,
    return
  }
  func.func @transform_0(%arg0: i32, %arg1: i32) -> (i32, i32) {
    %c1_i32 = arith.constant 1 : i32
    %0 = arith.muli %arg0, %c1_i32 : i32
    %1 = arith.addi %0, %arg1 : i32
    %c0_i32 = arith.constant 0 : i32
    %2 = arith.minsi %1, %c0_i32 : i32
    %c0_i32_0 = arith.constant 0 : i32
    %c0_i32_1 = arith.constant 0 : i32
    return %2, %c0_i32_0 : i32, i32
  }
  func.func @transform_1(%arg0: i32, %arg1: i32) -> (i32, i32) {
    %c1_i32 = arith.constant 1 : i32
    %0 = arith.muli %arg0, %c1_i32 : i32
    %1 = arith.addi %0, %arg1 : i32
    %c0_i32 = arith.constant 0 : i32
    %2 = arith.minsi %1, %c0_i32 : i32
    %c0_i32_0 = arith.constant 0 : i32
    %c0_i32_1 = arith.constant 0 : i32
    return %2, %c0_i32_0 : i32, i32
  }
  func.func @transform_2(%arg0: i32, %arg1: i32) -> (i32, i32, i32) {
    %c0_i32 = arith.constant 0 : i32
    %c0_i32_0 = arith.constant 0 : i32
    %c0_i32_1 = arith.constant 0 : i32
    return %arg0, %c0_i32, %c0_i32_0 : i32, i32, i32
  }
  func.func @transform_3(%arg0: i32, %arg1: i32) -> (i32, i32, i32) {
    %c0_i32 = arith.constant 0 : i32
    %c0_i32_0 = arith.constant 0 : i32
    %c0_i32_1 = arith.constant 0 : i32
    return %arg0, %c0_i32, %c0_i32_0 : i32, i32, i32
  }
}

</mosaic_0001>

<bundles_post_ra>
// kernel: tpu_custom_call.1
= control target key start
LH: loop header
LB: loop body
LE: loop exit
PB: predicated region body
PF: predicated region fallthrough
CT: control target
= control target key end

     0   :  { %9 = vsyncpa [#allocation3], 0  ;;  %s1039_s0 = inlined_call_operand.hbm [shape: f32[16,128], index: 0, kind: input, shape index: {}]   ;;  %s1040_s1 = inlined_call_operand.hbm [shape: f32[16,128], index: 1, kind: input, shape index: {}]   ;;  %s1041_s2 = inlined_call_operand.hbm [shape: f32[2,8,128], index: 2, kind: output, shape index: {0}]   ;;  %s1042_s3 = inlined_call_operand.hbm [shape: s32[2,8,128], index: 3, kind: output, shape index: {1}]  }
   0x1   :  { %11 = vsyncpa [#allocation3 + $0x1], 0 }
   0x2   :  { %12 = vsyncpa [#allocation6], 0 }
   0x3   :  { %14 = vsyncpa [#allocation6 + $0x1], 0 }
   0x4   :  { %15 = vsyncpa [#allocation4], 0 }
   0x5   :  { %17 = vsyncpa [#allocation4 + $0x1], 0 }
   0x6   :  { %18 = vsyncpa [#allocation9], 0 }
   0x7   :  { %20 = vsyncpa [#allocation9 + $0x1], 0  ;;  %s845_s12 = smov 0   ;;  %s847_s13 = smov 0  }
   0x8   :  { %s849_s14 = smov 0   ;;  %s851_s15 = smov 0  }
   0x9   :  { %s853_s16 = smov 0   ;;  %s855_s17 = smov 0  }
   0xa   :  { %s857_s18 = smov 0   ;;  %s859_s19 = smov 0  }
   0xb LB: > { %s495_s20 = sadd.s32 4294967295, %s818_s19   ;;  %s496_s21 = sadd.s32 4294967294, %s818_s19   ;;  %s818_s19 = sphi %s859_s19, %s26_s19   ;;  %s814_s18 = sphi %s857_s18, %s1054_s18   ;;  %s810_s17 = sphi %s855_s17, %s1053_s17   ;;  %s806_s16 = sphi %s853_s16, %s1029_s16   ;;  %s802_s15 = sphi %s851_s15, %s1052_s15   ;;  %s798_s14 = sphi %s849_s14, %s1051_s14   ;;  %s794_s13 = sphi %s847_s13, %s1050_s13   ;;  %s790_s12 = sphi %s845_s12, %s1049_s12  }
   0xc   : > { %s38_s22 = sadd.s32 1, %s814_s18  ;;  %p787_p1 = scmp.ne.s32.totalorder %s806_s16, 0 }
   0xd   : > { %p40_p0 = scmp.ge.s32.totalorder %s38_s22, 2  ;;  %p59_p2 = scmp.eq.s32.totalorder %s818_s19, 0 }
   0xe   : > { %p64_p3 = scmp.ne.s32.totalorder %s806_s16, %s802_s15  ;;  %p65_p5 = scmp.eq.s32.totalorder %s495_s20, 0 }
   0xf   : > { %s1056_s22 = smov (%p40_p0, %s38_s22), 0  ;;  %p891_p4 = por %p787_p1, %p59_p2 }
  0x10   : > { %p895_p6 = por %p65_p5, %p64_p3  ;;  %s106_s25 = ssub.s32 %s814_s18, %s1056_s22 }
  0x11   : > { %p107_p7 = scmp.eq.s32.totalorder %s106_s25, 0  ;;  %s109_s26 = sadd.s32 1, %s798_s14 }
  0x12   : > { %p119_p8 = scmp.ne.s32.totalorder %s798_s14, %s794_s13  ;;  %p120_p9 = scmp.eq.s32.totalorder %s495_s20, 1 }
  0x13   : > { %s903_s27 = scalar_select %p107_p7, %s798_s14, %s109_s26  }
  0x14   : > { %p125_p10 = scmp.ne.s32.totalorder %s794_s13, %s790_s12  ;;  %p126_p11 = scmp.eq.s32.totalorder %s496_s21, 1 }
  0x15   : > { %p909_p12 = por %p120_p9, %p119_p8  ;;  %p498_p13 = scmp.ge.s32.totalorder %s818_s19, 2 }
  0x16   : > { %p914_p0 = por %p126_p11, %p125_p10  ;;  %p541_p1 = scmp.lt.s32.totalorder %s818_s19, 2 }
  0x17   : > { %s185_s5 = sshll.u32 %s1039_s0, 4  ;;  %s820_s6 = smov [#allocation2]   ;;  %s186_s5 = int_to_ptr.hbm [resolvable:$true] %s185_s5 }
  0x18   : > { %s187_s7 = sshll.u32 %s820_s6, 4  ;;  %p924_p2 = pnand %p541_p1, %p891_p4  ;;  %s188_s7 = int_to_ptr.vmem [resolvable:$true] %s187_s7 }
  0x19   : > { %p505_p3 = scmp.ge.s32.totalorder %s818_s19, 1  ;;  %p220_p5 = scmp.lt.s32.totalorder %s818_s19, 3 }
  0x1a   : > { %s619_s9 = sshra.s32 %s186_s5, 4  ;;  %p623_p8 = pneg %p924_p2  ;;  %s620_s9 = int_to_ptr.hbm [resolvable:$true] %s619_s9 }
  0x1b   : > { %s621_s10 = scalar_lea.hbm %s620_s9, 16  ;;  %s626_s20 = scalar_lea.hbm %s1039_s0, 16 }
  0x1c   : > { %p622_p7 = scmp.ne.s32.totalorder %s620_s9, %s621_s10  ;;  %p628_p4 = scmp.lt.s32.totalorder %s626_s20, %s621_s10 }
  0x1e   : > { %p624_p9 = pnand %p623_p8, %p622_p7 }
  0x20   : > { %p625_p10 = pneg %p624_p9 }
  0x22   : > { %p630_p11 = pnand %p628_p4, %p625_p10 }
  0x24   : > { %633 = shalt.err (!%p630_p11)
}
  0x25   : > { %s821_s21 = smov 128   ;;  %s822_s23 = smov 8  }
  0x26   : > { %530 = dma.hbm_to_vmem [thread:$0]  (!%p924_p2), %s186_s5, 256, %s188_s7, [#allocation3], %s821_s21, %s821_s21, %s822_s23  }
  0x27   : > { %p944_p1 = pnand %p505_p3, %p220_p5  ;;  %s210_s4 = sshll.u32 %s1040_s1, 4  ;;  %s211_s4 = int_to_ptr.hbm [resolvable:$true] %s210_s4 }
  0x28   : > { %s823_s6 = smov [#allocation5]   ;;  %s649_s10 = sshra.s32 %s211_s4, 4  ;;  %s650_s10 = int_to_ptr.hbm [resolvable:$true] %s649_s10 }
  0x29   : > { %s212_s9 = sshll.u32 %s823_s6, 4  ;;  %s651_s11 = scalar_lea.hbm %s650_s10, 16  ;;  %s213_s9 = int_to_ptr.vmem [resolvable:$true] %s212_s9 }
  0x2a   : > { %p652_p7 = scmp.ne.s32.totalorder %s650_s10, %s651_s11  ;;  %s656_s15 = scalar_lea.hbm %s1040_s1, 16 }
  0x2b   : > { %p658_p3 = scmp.lt.s32.totalorder %s656_s15, %s651_s11 }
  0x2c   : > { %p654_p9 = pnand %p652_p7, %p623_p8 }
  0x2e   : > { %p655_p10 = pneg %p654_p9 }
  0x30   : > { %p660_p5 = pnand %p658_p3, %p655_p10 }
  0x32   : > { %663 = shalt.err (!%p660_p5)
}
  0x33   : > { %533 = dma.hbm_to_vmem [thread:$0]  (!%p924_p2), %s211_s4, 256, %s213_s9, [#allocation6], %s821_s21, %s821_s21, %s822_s23  }
  0x34   : > { %224 = sbr.rel (%p944_p1) target bundleno = 90 (0x5a), region = 28  ;;  %s226_s20 = sand.u32 (!%p944_p1), 1, %s806_s16  }
  0x35   : > { %s506_s26 = sshll.u32 (!%p944_p1), %s226_s20, 4  ;;  %s227_s30 = scalar_lea.sflag (!%p944_p1), [#allocation3], %s226_s20 }
  0x36   : > { %s230_s6 = scalar_lea.vmem (!%p944_p1), [#allocation2], %s506_s26 }
  0x39   : > { %772 = dma.done.wait (%p895_p6), %s227_s30, 256  }
  0x3a   : > { %774 = vsyncadd (%p895_p6), %s227_s30, 4294967040  ;;  %s237_s10 = scalar_lea.sflag [#allocation6], %s226_s20  ;;  %s240_s11 = scalar_lea.vmem [#allocation5], %s506_s26 }
  0x3b   : > { %776 = dma.done.wait (%p895_p6), %s237_s10, 256  }
  0x3c   : > { %778 = vsyncadd (%p895_p6), %s237_s10, 4294967040  ;;  %s510_s8 = sshll.u32 %s810_s17, 4  ;;  %v290_v0 = vlaneseq  ;;  %s972_s21 = sand.u32 1, %s794_s13   ;;  %v298_v6 = vld [vmem:[%s230_s6] sm:$0xff]  ;;  %v299_v7 = vld [vmem:[%s230_s6 + $0x8] sm:$0xff]  ;;  %v824_v13 = vmov 0  }
  0x3d   : > { %v293_v1 = vstv %s510_s8  ;;  %s508_s23 = sshll.u32 %s972_s21, 3  ;;  %s513_s25 = sshll.u32 %s810_s17, 3  ;;  %v300_v8 = vld [vmem:[%s240_s11] sm:$0xff]  ;;  %v301_v9 = vld [vmem:[%s240_s11 + $0x8] sm:$0xff] }
  0x3e   : > { %v291_v2 = vshrl.u32 %v290_v0, 7  ;;  %vm302_vm2 = vcmp.gt.f32.partialorder %v300_v8, 0.05  ;;  %v310_v10 = vsub.f32 %v298_v6, %v300_v8  ;;  %s356_s9 = scalar_lea.hbm %s1042_s3, %s513_s25  ;;  %vm303_vm3 = vcmp.gt.f32.partialorder %v301_v9, 0.05  ;;  %s342_s7 = scalar_lea.hbm %s1041_s2, %s513_s25 }
  0x3f   : > { %v311_v11 = vsub.f32 %v299_v7, %v301_v9  ;;  %s273_s15 = scalar_lea.vmem [#allocation8], %s508_s23  ;;  %s360_s26 = sshll.u32 %s356_s9, 4  ;;  %s361_s26 = int_to_ptr.hbm [resolvable:$true] %s360_s26 }
  0x40   : > { %v292_v3 = vadd.s32 8, %v291_v2  ;;  %v294_v4 = vadd.s32 %v293_v1, %v291_v2  ;;  %s358_s20 = sshll.u32 %s273_s15, 4  ;;  %s266_s30 = scalar_lea.vmem [#allocation7], %s508_s23  ;;  %s359_s20 = int_to_ptr.vmem [resolvable:$true] %s358_s20 }
  0x41   : > { %s344_s6 = sshll.u32 %s266_s30, 4  ;;  %s346_s10 = sshll.u32 %s342_s7, 4  ;;  %s982_s6 = int_to_ptr.vmem [resolvable:$true] %s344_s6  ;;  %s984_s10 = int_to_ptr.hbm [resolvable:$true] %s346_s10 }
  0x42   : > { %v295_v5 = vadd.s32 %v293_v1, %v292_v3  ;;  %vm296_vm0 = vcmp.lt.s32.totalorder %v294_v4, 16  ;;  %s332_s11 = scalar_lea.sflag [#allocation9], %s972_s21  ;;  %s693_s8 = sshra.s32 %s361_s26, 4  ;;  %s694_s8 = int_to_ptr.hbm [resolvable:$true] %s693_s8 }
  0x43   : > { %vm308_vm4 = vmand %vm302_vm2, %vm296_vm0  ;;  %s695_s25 = scalar_lea.hbm %s694_s8, 8  ;;  %s699_s4 = scalar_lea.hbm %s1042_s3, 16 }
  0x44   : > { %vm297_vm1 = vcmp.lt.s32.totalorder %v295_v5, 16  ;;  %v312_v12 = vsel %vm308_vm4, %v310_v10, 0.0  ;;  %v321_v14 = vsel %vm308_vm4, 1, %v824_v13  ;;  %p696_p6 = scmp.ne.s32.totalorder %s694_s8, %s695_s25  ;;  %p700_p4 = scmp.lt.s32.totalorder %s694_s8, %s1042_s3 }
  0x45   : > { %vm309_vm5 = vmand %vm303_vm3, %vm297_vm1  ;;  %v314_v16 = vmul.f32 %v312_v12, %v312_v12  ;;  %p701_p11 = scmp.lt.s32.totalorder %s699_s4, %s695_s25 }
  0x46   : > { %v313_v15 = vsel %vm309_vm5, %v311_v11, 0.0  ;;  %v322_v17 = vsel %vm309_vm5, 1, %v824_v13  ;;  %p697_p2 = pnand %p696_p6, %p909_p12 }
  0x47   : > { %v315_v18 = vmul.f32 %v313_v15, %v313_v15  ;;  %v323_v19 = vadd.s32 %v322_v17, %v321_v14  ;;  %p702_p1 = por %p701_p11, %p700_p4 }
  0x48   : > { %p698_p8 = pneg %p697_p2 }
  0x49   : > { %v317_v20 = vadd.f32 %v315_v18, %v314_v16  ;;  %325 = vst [vmem:[%s273_s15] sm:$0xff] %v323_v19 }
  0x4a   : > { %p703_p7 = pnand %p702_p1, %p698_p8 }
  0x4c   : > { %706 = shalt.err (!%p703_p7)
}
  0x4d   : > { %524 = dma.vmem_to_hbm [thread:$0]  (%p909_p12), %s359_s20, 128, %s361_s26, %s332_s11   ;;  %319 = vst [vmem:[%s266_s30] sm:$0xff] %v317_v20 }
  0x4e   : > { %s327_s5 = scalar_lea.sflag [#allocation4], %s972_s21  ;;  %s721_s7 = sshra.s32 %s984_s10, 4  ;;  %s722_s7 = int_to_ptr.hbm [resolvable:$true] %s721_s7 }
  0x4f   : > { %s723_s15 = scalar_lea.hbm %s722_s7, 8  ;;  %s727_s24 = scalar_lea.hbm %s1041_s2, 16 }
  0x50   : > { %p724_p9 = scmp.ne.s32.totalorder %s722_s7, %s723_s15  ;;  %p728_p5 = scmp.lt.s32.totalorder %s722_s7, %s1041_s2 }
  0x51   : > { %p729_p6 = scmp.lt.s32.totalorder %s727_s24, %s723_s15 }
  0x52   : > { %p725_p10 = pnand %p724_p9, %p909_p12 }
  0x53   : > { %p730_p2 = por %p729_p6, %p728_p5 }
  0x54   : > { %p726_p3 = pneg %p725_p10 }
  0x56   : > { %p731_p8 = pnand %p730_p2, %p726_p3 }
  0x58   : > { %734 = shalt.err (!%p731_p8)
}
  0x59   : > { %523 = dma.vmem_to_hbm [thread:$0]  (%p909_p12), %s982_s6, 128, %s984_s10, %s327_s5  }
  0x5a PF: > { %s372_s21 = sand.u32 1, %s790_s12   ;;  %p535_p4 = pnand %p498_p13, %p914_p0 }
  0x5b   : > { %s373_s20 = scalar_lea.sflag [#allocation4], %s372_s21 }
  0x5c   : > { %p536_p11 = pneg %p535_p4 }
  0x5e   : > { %780 = dma.done.wait (%p536_p11), %s373_s20, 128  }
  0x5f   : > { %782 = vsyncadd (%p536_p11), %s373_s20, 4294967168  ;;  %s383_s26 = scalar_lea.sflag [#allocation9], %s372_s21 }
  0x60   : > { %784 = dma.done.wait (%p536_p11), %s383_s26, 128  }
  0x61   : > { %786 = vsyncadd (%p536_p11), %s383_s26, 4294967168  ;;  %s26_s19 = sadd.s32 1, %s818_s19   ;;  %s1049_s12 = smov %s794_s13 }
  0x62   : > { %p23_p1 = scmp.ge.s32.totalorder %s26_s19, 4   ;;  %s1050_s13 = smov %s798_s14 }
  0x63   : > { %s1051_s14 = smov %s903_s27  ;;  %s1052_s15 = smov %s806_s16 }
  0x64   : > { %s1029_s16 = smov 0   ;;  %s1053_s17 = smov %s814_s18 }
  0x65   : > { %s1054_s18 = smov %s1056_s22  ;;  %25 = sbr.rel (!%p23_p1) target bundleno = 11 (0xb), region = 107 }
  0x6a   :  { %389 = vsyncpa [#allocation3], 1 }
  0x6b   :  { %391 = vsyncpa [#allocation3 + $0x1], 1 }
  0x6c   :  { %392 = vsyncpa [#allocation6], 1 }
  0x6d   :  { %394 = vsyncpa [#allocation6 + $0x1], 1 }
  0x6e   :  { %395 = vsyncpa [#allocation4], 1 }
  0x6f   :  { %397 = vsyncpa [#allocation4 + $0x1], 1 }
  0x70   :  { %398 = vsyncpa [#allocation9], 1 }
  0x71   :  { %400 = vsyncpa [#allocation9 + $0x1], 1 }

</bundles_post_ra>
